<compile_context>
chip_gen: v7x
topology: tpu7x:2x2x1
jax: 0.10.0
libtpu: 0.0.40
codegen_flags: <defaults>
</compile_context>

<pallas_src>
import jax
import jax.numpy as jnp
from jax import lax
from jax.experimental import pallas as pl
from jax.experimental.pallas import tpu as pltpu

_LANE = 128
_ACC_W = 2048            # lanes per inner chunk / accumulator width
_MAX_LANES = 64 * 1024   # cap on lane-tile width


def _cdiv(a: int, b: int) -> int:
    return -(-a // b)


def _chip_info():
    """Best-effort chip detection (never raises). Returns (name, vmem_bytes)."""
    try:
        kind = jax.devices()[0].device_kind.lower()
    except Exception:
        return "unknown", 64 * 1024 * 1024
    if "v5 lite" in kind or "v5e" in kind or "v5litepod" in kind:
        return "v5e", 128 * 1024 * 1024
    if "v6" in kind:
        return "v6e", 128 * 1024 * 1024
    if "v7" in kind:
        return "v7x", 64 * 1024 * 1024
    return "other", 64 * 1024 * 1024  # conservative VMEM assumption


def _make_em_kernel(c: int, t_hw: int, acc_w: int, hw_total: int,
                    tiles_per_part: int, needs_mask: bool):
    n_chunks = t_hw // acc_w

    def kernel(x_ref, out_ref):
        # x_ref: (C, t_hw) block (batch dim squeezed); out_ref: (1, acc_w).
        p = pl.program_id(1)
        j = pl.program_id(2)

        # Zero the resident per-(batch, part) accumulator at the start of j.
        @pl.when(j == 0)
        def _():
            out_ref[...] = jnp.zeros_like(out_ref)

        # Hoisted loop invariants (JAX does not CSE broadcasts inside loops).
        ones_row = jnp.ones((1, c), jnp.float32)          # MXU LHS
        if needs_mask:
            lane = lax.broadcasted_iota(jnp.int32, (1, acc_w), 1)
            tile_base = (p * tiles_per_part + j) * t_hw   # global lane offset

        def chunk_body(k, acc):
            start = k * acc_w
            xc = x_ref[:, pl.ds(pl.multiple_of(start, _LANE), acc_w)]
            xc = xc.astype(jnp.float32)                   # (C, acc_w), bounded

            # Numerically-stable per-lane entropy over channels (sublanes).
            m = jnp.max(xc, axis=0, keepdims=True)        # (1, acc_w)  -- XLU
            z = xc - m
            e = jnp.exp(z)                                # EUP
            # Channel sums on the (otherwise idle) MXU instead of the XLU.
            s = jnp.dot(ones_row, e, preferred_element_type=jnp.float32)
            sez = jnp.dot(ones_row, e * z, preferred_element_type=jnp.float32)

            inv = pl.reciprocal(s, approx=True)           # EUP slot
            inv = inv * (2.0 - s * inv)                   # Newton step -> ~f32 exact
            ent = jnp.log(s) - sez * inv                  # (1, acc_w)

            if needs_mask:
                # Must stay a select (not a multiply): overhang lanes can hold
                # stale/NaN VMEM; entropy is strictly per-lane so valid lanes
                # cannot be contaminated.
                pos = tile_base + start + lane
                ent = jnp.where(pos < hw_total, ent, 0.0)
            return acc + ent

        acc0 = jnp.zeros((1, acc_w), jnp.float32)
        acc = lax.fori_loop(0, n_chunks, chunk_body, acc0,
                            unroll=(n_chunks <= 8))
        out_ref[...] += acc

    return kernel


def em_loss_for_target(x: jax.Array) -> jax.Array:
    """Entropy-minimization loss for (N, C, ...) logits, softmax over dim 1."""
    x = jnp.asarray(x)
    assert x.ndim >= 2, "expect (N, C, ...) logits"
    n, c = int(x.shape[0]), int(x.shape[1])
    hw = 1
    for d in x.shape[2:]:
        hw *= int(d)

    # Free (contiguous) reshape: channels -> sublanes, spatial -> lanes.
    x3 = x.reshape(n, c, hw)
    itemsize = int(jnp.dtype(x3.dtype).itemsize)

    chip, vmem_cap = _chip_info()
    if chip == "v5e":          # 128 MiB VMEM, DMA-bound: big blocks, deep buffers
        target_block_bytes = 10 * 1024 * 1024
    elif chip == "v6e":
        target_block_bytes = 6 * 1024 * 1024
    else:                      # v7x / unknown: 64 MiB VMEM -> smaller blocks
        target_block_bytes = 4 * 1024 * 1024

    # --- Lane-tile selection (sized from the *actual* itemsize) ---
    hw_padded = _cdiv(hw, _LANE) * _LANE
    max_lanes = (target_block_bytes // (itemsize * c)) // _LANE * _LANE
    max_lanes = min(max(max_lanes, _LANE), _MAX_LANES)
    t_hw = min(hw_padded, max_lanes)
    if t_hw > _ACC_W:
        t_hw = (t_hw // _ACC_W) * _ACC_W       # keep t_hw a multiple of acc_w
    acc_w = min(t_hw, _ACC_W)
    num_hw_tiles = _cdiv(hw, t_hw)

    # --- Second parallel axis over HW tiles (helps v7x when N is small/odd) ---
    n_parts = 2 if (n % 2 == 1 and num_hw_tiles >= 2) else 1
    tiles_per_part = _cdiv(num_hw_tiles, n_parts)
    padded_tiles = n_parts * tiles_per_part

    needs_mask = (hw % t_hw != 0) or (padded_tiles > num_hw_tiles)

    kernel = _make_em_kernel(c, t_hw, acc_w, hw, tiles_per_part, needs_mask)

    if padded_tiles > num_hw_tiles:
        # Clamp padding tiles onto the last real tile; their contribution is
        # zeroed by the in-kernel mask.
        def in_index_map(i, p, j):
            g = jnp.minimum(p * tiles_per_part + j, num_hw_tiles - 1)
            return (i, 0, g)
    else:
        def in_index_map(i, p, j):
            return (i, 0, p * tiles_per_part + j)

    in_spec_kwargs = {}
    buf_count = 2
    if chip == "v5e" and tiles_per_part >= 3:
        buf_count = 3
        in_spec_kwargs["pipeline_mode"] = pl.Buffered(3)

    in_spec = pl.BlockSpec((None, c, t_hw), in_index_map, **in_spec_kwargs)
    out_spec = pl.BlockSpec((None, 1, acc_w),
                            lambda i, p, j: (i * n_parts + p, 0, 0))

    # VMEM budget from the actual buffer plan (+ slack for compiler scratch).
    block_bytes = c * t_hw * itemsize
    vmem_limit = buf_count * block_bytes + 2 * acc_w * 4 + 4 * 1024 * 1024
    vmem_limit = max(vmem_limit, 16 * 1024 * 1024)
    vmem_limit = min(vmem_limit, int(0.75 * vmem_cap))

    partials = pl.pallas_call(
        kernel,
        out_shape=jax.ShapeDtypeStruct((n * n_parts, 1, acc_w), jnp.float32),
        grid_spec=pltpu.PrefetchScalarGridSpec(
            num_scalar_prefetch=0,
            grid=(n, n_parts, tiles_per_part),
            in_specs=[in_spec],
            out_specs=out_spec,
        ),
        compiler_params=pltpu.CompilerParams(
            dimension_semantics=("parallel", "parallel", "arbitrary"),
            vmem_limit_bytes=int(vmem_limit),
        ),
    )(x3)

    # Tiny final reduce + mean in the wrapper (tree-style, better precision).
    return jnp.sum(partials) / jnp.float32(n * hw)


def em_loss_reference(x: jax.Array) -> jax.Array:
    """Pure-JAX reference mirroring the PyTorch module."""
    logp = jax.nn.log_softmax(x, axis=1)
    p = jax.nn.softmax(x, axis=1)
    return -(p * logp).sum(axis=1).mean()


if __name__ == "__main__":
    key = jax.random.PRNGKey(0)
    k0, k1, k2 = jax.random.split(key, 3)

    # NCHW logits, small shapes: batch=2, channels=4, spatial=16x16
    x = jax.random.normal(k0, (2, 4, 16, 16), dtype=jnp.float32) * 3.0
    loss = jax.block_until_ready(em_loss_for_target(x))
    ref = jax.block_until_ready(em_loss_reference(x))
    assert jnp.allclose(loss, ref, rtol=1e-4, atol=1e-6), (loss, ref)

    # Ragged shape (odd spatial extent, C not a multiple of 8) exercises the
    # masked-overhang path.
    x2 = jax.random.normal(k1, (2, 19, 17, 17), dtype=jnp.float32) * 3.0
    loss2 = jax.block_until_ready(em_loss_for_target(x2))
    ref2 = jax.block_until_ready(em_loss_reference(x2))
    assert jnp.allclose(loss2, ref2, rtol=1e-4, atol=1e-6), (loss2, ref2)

    # Odd batch with multiple lane tiles exercises the second parallel grid
    # axis (HW split across TCs) and the multi-chunk inner loop.
    x3 = jax.random.normal(k2, (1, 4, 80, 80), dtype=jnp.float32) * 3.0
    loss3 = jax.block_until_ready(em_loss_for_target(x3))
    ref3 = jax.block_until_ready(em_loss_reference(x3))
    assert jnp.allclose(loss3, ref3, rtol=1e-4, atol=1e-6), (loss3, ref3)

    print("KERNEL_OK")
</pallas_src>

<mosaic_0001>
module attributes {stable_mosaic.version = 11 : i64} {
  func.func @kernel(%arg0: i32, %arg1: i32, %arg2: i32, %arg3: memref<1x4x256xf32, #tpu.memory_space<vmem>>, %arg4: memref<1x1x256xf32, #tpu.memory_space<vmem>>) attributes {dimension_semantics = [#tpu.dimension_semantics<parallel>, #tpu.dimension_semantics<parallel>, #tpu.dimension_semantics<arbitrary>], iteration_bounds = array<i64: 2, 1, 1>, scalar_prefetch = 0 : i64, scratch_operands = 0 : i64, tpu.core_type = #tpu.core_type<tc>, window_params = [{transform_indices = @transform_0, window_bounds = array<i64: 1, 4, 256>}, {transform_indices = @transform_1, window_bounds = array<i64: 1, 1, 256>}]} {
    %c0_i32 = arith.constant 0 : i32
    %0 = arith.cmpi eq, %arg2, %c0_i32 : i32
    %1 = arith.extui %0 : i1 to i32
    %c0_i32_0 = arith.constant 0 : i32
    %2 = arith.cmpi ne, %1, %c0_i32_0 : i32
    scf.if %2 {
      %cst_14 = arith.constant 0.000000e+00 : f32
      %33 = vector.broadcast %cst_14 : f32 to vector<1x256xf32>
      %c0_15 = arith.constant 0 : index
      %c0_16 = arith.constant 0 : index
      %c0_17 = arith.constant 0 : index
      %34 = vector.load %arg4[%c0_15, %c0_16, %c0_17] : memref<1x1x256xf32, #tpu.memory_space<vmem>>, vector<1x1x256xf32>
      %35 = vector.shape_cast %34 : vector<1x1x256xf32> to vector<1x256xf32>
      %36 = vector.shape_cast %33 : vector<1x256xf32> to vector<1x1x256xf32>
      tpu.vector_store %arg4[%c0_15, %c0_16, %c0_17], %36 {strides = array<i32>} : memref<1x1x256xf32, #tpu.memory_space<vmem>>, vector<1x1x256xf32>,
    } else {
    }
    %cst = arith.constant 1.000000e+00 : f32
    %3 = vector.broadcast %cst : f32 to vector<1x4xf32>
    %cst_1 = arith.constant 0.000000e+00 : f32
    %4 = vector.broadcast %cst_1 : f32 to vector<1x256xf32>
    %c0_i32_2 = arith.constant 0 : i32
    %c256_i32 = arith.constant 256 : i32
    %5 = arith.muli %c0_i32_2, %c256_i32 : i32
    %6 = tpu.assume_multiple %5, 128 : i32
    %c0 = arith.constant 0 : index
    %c0_3 = arith.constant 0 : index
    %7 = arith.index_cast %6 : i32 to index
    %8 = vector.load %arg3[%c0, %c0_3, %7] : memref<1x4x256xf32, #tpu.memory_space<vmem>>, vector<1x4x256xf32>
    %9 = vector.shape_cast %8 : vector<1x4x256xf32> to vector<4x256xf32>
    %cst_4 = arith.constant dense<0xFF800000> : vector<256xf32>
    %10 = vector.multi_reduction <maximumf>, %9, %cst_4 [0] : vector<4x256xf32> to vector<256xf32>
    %11 = vector.shape_cast %10 : vector<256xf32> to vector<1x256xf32>
    %12 = vector.broadcast %11 : vector<1x256xf32> to vector<4x256xf32>
    %13 = arith.subf %9, %12 : vector<4x256xf32>
    %14 = math.exp %13 : vector<4x256xf32>
    %cst_5 = arith.constant dense<0.000000e+00> : vector<1x256xf32>
    %15 = tpu.matmul %3, %14, %cst_5 {dimension_numbers = #tpu.dot_dimension_numbers<[1], [0], [0], [1], [0, 0, 1, 1], [], []>} : vector<1x4xf32>, vector<4x256xf32>, vector<1x256xf32> -> vector<1x256xf32>
    %16 = arith.mulf %14, %13 : vector<4x256xf32>
    %cst_6 = arith.constant dense<0.000000e+00> : vector<1x256xf32>
    %17 = tpu.matmul %3, %16, %cst_6 {dimension_numbers = #tpu.dot_dimension_numbers<[1], [0], [0], [1], [0, 0, 1, 1], [], []>} : vector<1x4xf32>, vector<4x256xf32>, vector<1x256xf32> -> vector<1x256xf32>
    %18 = tpu.reciprocal %15 {approx = true} : vector<1x256xf32> -> vector<1x256xf32>
    %19 = arith.mulf %15, %18 : vector<1x256xf32>
    %cst_7 = arith.constant 2.000000e+00 : f32
    %20 = vector.broadcast %cst_7 : f32 to vector<1x256xf32>
    %21 = arith.subf %20, %19 : vector<1x256xf32>
    %22 = arith.mulf %18, %21 : vector<1x256xf32>
    %23 = math.log %15 : vector<1x256xf32>
    %24 = arith.mulf %17, %22 : vector<1x256xf32>
    %25 = arith.subf %23, %24 : vector<1x256xf32>
    %26 = arith.addf %4, %25 : vector<1x256xf32>
    %c1_i32 = arith.constant 1 : i32
    %c0_8 = arith.constant 0 : index
    %c0_9 = arith.constant 0 : index
    %c0_10 = arith.constant 0 : index
    %27 = vector.load %arg4[%c0_8, %c0_9, %c0_10] : memref<1x1x256xf32, #tpu.memory_space<vmem>>, vector<1x1x256xf32>
    %28 = vector.shape_cast %27 : vector<1x1x256xf32> to vector<1x256xf32>
    %29 = arith.addf %28, %26 : vector<1x256xf32>
    %c0_11 = arith.constant 0 : index
    %c0_12 = arith.constant 0 : index
    %c0_13 = arith.constant 0 : index
    %30 = vector.load %arg4[%c0_11, %c0_12, %c0_13] : memref<1x1x256xf32, #tpu.memory_space<vmem>>, vector<1x1x256xf32>
    %31 = vector.shape_cast %30 : vector<1x1x256xf32> to vector<1x256xf32>
    %32 = vector.shape_cast %29 : vector<1x256xf32> to vector<1x1x256xf32>
    tpu.vector_store %arg4[%c0_11, %c0_12, %c0_13], %32 {strides = array<i32>} : memref<1x1x256xf32, #tpu.memory_space<vmem>>, vector<1x1x256xf32>,
    return
  }
  func.func @transform_0(%arg0: i32, %arg1: i32, %arg2: i32) -> (i32, i32, i32) {
    %c1_i32 = arith.constant 1 : i32
    %0 = arith.muli %arg1, %c1_i32 : i32
    %1 = arith.addi %0, %arg2 : i32
    %c0_i32 = arith.constant 0 : i32
    %c0_i32_0 = arith.constant 0 : i32
    return %arg0, %c0_i32, %1 : i32, i32, i32
  }
  func.func @transform_1(%arg0: i32, %arg1: i32, %arg2: i32) -> (i32, i32, i32) {
    %c1_i32 = arith.constant 1 : i32
    %0 = arith.muli %arg0, %c1_i32 : i32
    %1 = arith.addi %0, %arg1 : i32
    %c0_i32 = arith.constant 0 : i32
    %c0_i32_0 = arith.constant 0 : i32
    %c0_i32_1 = arith.constant 0 : i32
    return %1, %c0_i32, %c0_i32_0 : i32, i32, i32
  }
}

</mosaic_0001>

<bundles_post_ra>
// kernel: tpu_custom_call.1
= control target key start
LH: loop header
LB: loop body
LE: loop exit
PB: predicated region body
PF: predicated region fallthrough
CT: control target
= control target key end

     0   :  { %6 = vsyncpa [#allocation3], 0  ;;  %s926_s0 = inlined_call_operand.hbm [shape: f32[2,4,256], index: 0, kind: input, shape index: {}]   ;;  %s927_s1 = inlined_call_operand.hbm [shape: f32[2,1,256], index: 1, kind: output, shape index: {}]  }
   0x1   :  { %8 = vsyncpa [#allocation3 + $0x1], 0 }
   0x2   :  { %9 = vsyncpa [#allocation4], 0 }
   0x3   :  { %11 = vsyncpa [#allocation4 + $0x1], 0  ;;  %s731_s6 = smov 0   ;;  %s733_s7 = smov 0  }
   0x4   :  { %s735_s8 = smov 0   ;;  %s737_s9 = smov 0  }
   0x5   :  { %s739_s10 = smov 0   ;;  %s741_s11 = smov 0  }
   0x6 LB: > { %s503_s12 = sadd.s32 4294967295, %s714_s11   ;;  %s504_s13 = sadd.s32 4294967294, %s714_s11   ;;  %s714_s11 = sphi %s741_s11, %s17_s11   ;;  %s710_s10 = sphi %s739_s10, %s945_s10   ;;  %s706_s9 = sphi %s737_s9, %s944_s9   ;;  %s702_s8 = sphi %s735_s8, %s943_s8   ;;  %s698_s7 = sphi %s733_s7, %s942_s7   ;;  %s694_s6 = sphi %s731_s6, %s941_s6  }
   0x7   : > { %s36_s14 = sadd.s32 1, %s710_s10  ;;  %s47_s15 = sadd.s32 1, %s702_s8 }
   0x8   : > { %p38_p0 = scmp.ge.s32.totalorder %s36_s14, 2  ;;  %p54_p1 = scmp.ne.s32.totalorder %s702_s8, %s698_s7 }
   0x9   : > { %p55_p2 = scmp.eq.s32.totalorder %s714_s11, 0  ;;  %p60_p3 = scmp.ne.s32.totalorder %s698_s7, %s694_s6 }
   0xa   : > { %s947_s14 = smov (%p38_p0, %s36_s14), 0  ;;  %p61_p5 = scmp.eq.s32.totalorder %s503_s12, 0 }
   0xb   : > { %p772_p4 = por %p55_p2, %p54_p1  ;;  %s42_s17 = ssub.s32 %s710_s10, %s947_s14 }
   0xc   : > { %p86_p6 = scmp.eq.s32.totalorder %s503_s12, 1  ;;  %p45_p7 = scmp.eq.s32.totalorder %s42_s17, 0 }
   0xd   : > { %p778_p8 = por %p61_p5, %p60_p3  ;;  %p92_p10 = scmp.eq.s32.totalorder %s504_s13, 1 }
   0xe   : > { %p782_p9 = por %p86_p6, %p54_p1  ;;  %p538_p13 = scmp.lt.s32.totalorder %s714_s11, 2 }
   0xf   : > { %s787_s20 = scalar_select %p45_p7, %s702_s8, %s47_s15  }
  0x10   : > { %s931_s19 = scalar_select %p782_p9, 1, 0 }
  0x11   : > { %p789_p11 = por %p92_p10, %p60_p3  ;;  %s112_s22 = sand.u32 1, %s702_s8  }
  0x12   : > { %s507_s23 = sshll.u32 %s112_s22, 3  ;;  %s524_s24 = sshll.u32 %s710_s10, 7 }
  0x13   : > { %s932_s21 = scalar_select %p789_p11, 1, 0 }
  0x14   : > { %s800_s27 = scalar_lea.hbm %s926_s0, %s524_s24  ;;  %s116_s28 = scalar_lea.vmem [#allocation2], %s507_s23 }
  0x15   : > { %s127_s29 = sshll.u32 %s116_s28, 4  ;;  %p806_p0 = pnand %p538_p13, %p772_p4  ;;  %s802_s29 = int_to_ptr.vmem [resolvable:$true] %s127_s29 }
  0x16   : > { %s113_s2 = scalar_lea.sflag [#allocation3], %s112_s22  ;;  %s602_s3 = scalar_lea.hbm %s800_s27, 128 }
  0x17   : > { %p603_p3 = scmp.ne.s32.totalorder %s800_s27, %s602_s3  ;;  %p604_p5 = pneg %p806_p0 }
  0x18   : > { %s607_s12 = scalar_lea.hbm %s926_s0, 256  ;;  %p608_p4 = scmp.lt.u32.totalorder %s800_s27, %s926_s0 }
  0x19   : > { %p605_p6 = pnand %p604_p5, %p603_p3  ;;  %p609_p10 = scmp.lt.u32.totalorder %s607_s12, %s602_s3 }
  0x1a   : > { %p611_p12 = scmp.lt.u32.totalorder %s602_s3, %s800_s27 }
  0x1b   : > { %p606_p7 = pneg %p605_p6  ;;  %p610_p13 = por %p609_p10, %p608_p4 }
  0x1d   : > { %p612_p1 = por %p611_p12, %p610_p13 }
  0x1f   : > { %p613_p2 = pnand %p612_p1, %p606_p7 }
  0x21   : > { %616 = shalt.err (!%p613_p2)
}
  0x22   : > { %s617_s16 = scalar_lea.vmem %s802_s29, 128  ;;  %s716_s17 = smov [#allocation2]  }
  0x23   : > { %p618_p3 = scmp.ne.s32.totalorder %s802_s29, %s617_s16  ;;  %s622_s22 = sshll.u32 %s716_s17, 4  ;;  %s623_s22 = int_to_ptr.vmem [resolvable:$false] %s622_s22 }
  0x24   : > { %s624_s23 = scalar_lea.vmem %s623_s22, 256  ;;  %p625_p9 = scmp.lt.s32.totalorder %s802_s29, %s623_s22 }
  0x25   : > { %p620_p6 = pnand %p618_p3, %p604_p5  ;;  %p626_p4 = scmp.lt.s32.totalorder %s624_s23, %s617_s16 }
  0x27   : > { %p621_p11 = pneg %p620_p6  ;;  %p627_p10 = por %p626_p4, %p625_p9 }
  0x29   : > { %p628_p12 = pnand %p627_p10, %p621_p11 }
  0x2b   : > { %631 = shalt.err (!%p628_p12)
}
  0x2c   : > { %533 = dma.hbm_to_vmem [thread:$0]  (!%p806_p0), %s800_s27, 128, %s802_s29, %s113_s2  }
  0x2d   : > { %p934_p1 = scmp.lt.s32.totalorder %s714_s11, 3  ;;  %p935_p2 = scmp.ge.s32.totalorder %s714_s11, 1 }
  0x2f   : > { %p133_p5 = pnand %p935_p2, %p934_p1 }
  0x30   : > { %s842_s24 = sand.u32 (!%p133_p5), 1, %s698_s7  }
  0x31   : > { %136 = sbr.rel (%p133_p5) target bundleno = 350 (0x15e), region = 24  ;;  %s511_s25 = sshll.u32 (!%p133_p5), %s842_s24, 3 }
  0x32   : > { %s139_s26 = scalar_lea.sflag (!%p133_p5), [#allocation3], %s842_s24  ;;  %s142_s28 = scalar_lea.vmem (!%p133_p5), [#allocation2], %s511_s25 }
  0x38   : > { %685 = dma.done.wait (%p778_p8), %s139_s26, 128  }
  0x39   : > { %687 = vsyncadd (%p778_p8), %s139_s26, 4294967168  ;;  %s512_s27 = sshll.u32 %s842_s24, 1  ;;  %v168_v0 = vlaneseq  ;;  %v717_v1 = vmov 0.0   ;;  %vm177_vm1 = vcmask 1043456   ;;  %v173_v3 = vld [vmem:[%s142_s28] sm:$0xff]  ;;  %vm201_vm2 = vcmask 31744  }
  0x3a   : > { %273 = vmatprep.mubr.f32.mxu0 %v717_v1  ;;  %351 = vmatprep.mubr.f32.mxu1 %v717_v1  ;;  %s856_s29 = scalar_lea.vmem [#allocation5], %s512_s27  ;;  %v175_v4 = vcombine.high %v173_v3, %v173_v3  ;;  %v178_v5 = vsel %vm177_vm1, %v173_v3, -inf  ;;  %v718_v26 = vmov 1.0   ;;  %v719_v34 = vmov 1966171168   ;;  %s525_s18 = sshll.u32 %s706_s9, 5 }
  0x3b   : > { %vm852_vm0 = vcmp.lt.s32.totalorder %v168_v0, 256  ;;  %v179_v6 = vrot.slane %v178_v5, 4  ;;  %v381_v35 = vunpack.c.l.s4 %v719_v34  ;;  %v384_v46 = vshrl.u32 %v168_v0, 7  ;;  %s417_s30 = sshll.u32 %s856_s29, 4  ;;  %s874_s4 = scalar_lea.hbm %s927_s1, %s525_s18  ;;  %s876_s30 = int_to_ptr.vmem [resolvable:$true] %s417_s30 }
  0x3c   : > { %172 = vst.msk [vmem:[%s856_s29] sm:$0x3] %vm852_vm0, %v717_v1  ;;  %v185_v7 = vsel %vm177_vm1, %v175_v4, -inf  ;;  %s402_s5 = scalar_lea.sflag [#allocation4], %s842_s24  ;;  %s632_s12 = scalar_lea.vmem %s876_s30, 32 }
  0x3d   : > { %v180_v8 = vmax.f32 %v178_v5, %v179_v6  ;;  %v186_v9 = vrot.slane %v185_v7, 4  ;;  %v382_v42 = vunpack.c.0.s8 %v381_v35  ;;  %p633_p8 = scmp.ne.s32.totalorder %s876_s30, %s632_s12  ;;  %p938_p9 = scmp.ne.s32.totalorder %s931_s19, 0 }
  0x3e   : > { %s720_s9 = smov [#allocation5]  }
  0x3f   : > { %v181_v10 = vrot.slane %v180_v8, 2  ;;  %v187_v11 = vmax.f32 %v185_v7, %v186_v9  ;;  %v385_v51 = vsub.s32 %v382_v42, %v384_v46  ;;  %p634_p11 = pnand %p633_p8, %p938_p9  ;;  %s636_s13 = sshll.u32 %s720_s9, 4  ;;  %s637_s13 = int_to_ptr.vmem [resolvable:$false] %s636_s13 }
  0x40   : > { %s638_s15 = scalar_lea.vmem %s637_s13, 64  ;;  %p639_p7 = scmp.lt.s32.totalorder %s876_s30, %s637_s13 }
  0x41   : > { %v182_v12 = vmax.f32 %v180_v8, %v181_v10  ;;  %v188_v13 = vrot.slane %v187_v11, 2  ;;  %p635_p0 = pneg %p634_p11  ;;  %p640_p13 = scmp.lt.s32.totalorder %s638_s15, %s632_s12 }
  0x43   : > { %v183_v14 = vrot.slane %v182_v12, 1  ;;  %v189_v15 = vmax.f32 %v187_v11, %v188_v13  ;;  %v376_v54 = vld [vmem:[%s856_s29] sm:$0x3]  ;;  %p641_p3 = por %p640_p13, %p639_p7 }
  0x45   : > { %v184_v16 = vmax.f32 %v182_v12, %v183_v14  ;;  %v190_v17 = vrot.slane %v189_v15, 1  ;;  %p642_p6 = pnand %p641_p3, %p635_p0 }
  0x47   : > { %v191_v18 = vmax.f32 %v189_v15, %v190_v17 }
  0x49   : > { %v194_v19 = vcombine.low %v184_v16, %v191_v18 }
  0x4b   : > { %v196_v20 = vsub.f32 %v173_v3, %v194_v19 }
  0x4d   : > { %v197_v21 = vmul.f32 1.442695, %v196_v20 }
  0x4f   : > { %592 = vpow2.f32 %v197_v21 }
  0x59   : > { %v593_v22 = vpop.eup %592 }
  0x5a   : > { %v200_v23 = vcombine.high %v593_v22, %v593_v22  ;;  %v280_v24 = vmul.f32 %v593_v22, %v196_v20 }
  0x5c   : > { %513 = vmatprep.subr.msk.mxu0 %vm177_vm1, %v200_v23  ;;  %v282_v25 = vcombine.high %v280_v24, %v280_v24 }
  0x5d   : > { %514 = vmatpush1.msk.msra.mxu0 %vm177_vm1, %v593_v22 }
  0x5e   : > { %515 = vmatmul.mubr.msk.f32.vlgmr.msra.gmra.mrb[0].mxu0 %vm201_vm2, %v718_v26  ;;  %516 = vmatprep.subr.msk.mxu1 %vm177_vm1, %v282_v25 }
  0x5f   : > { %517 = vmatpush1.msk.msra.mxu1 %vm177_vm1, %v280_v24 }
  0x60   : > { %518 = vmatmul.mubr.msk.f32.vlgmr.msra.gmra.mrb[0].mxu1 %vm201_vm2, %v718_v26 }
 0x131   : > { %v275_v27 = vpop.f32.mrb[0].mxu0 }
 0x132   : > { %594 = vrcp.f32 %v275_v27  ;;  %v277_v28 = vpop.f32.mrb[1].mxu0 }
 0x133   : > { %v353_v29 = vpop.f32.mrb[0].mxu1  ;;  %596 = vrcp.f32 %v277_v28 }
 0x134   : > { %v355_v30 = vpop.f32.mrb[1].mxu1  ;;  %598 = vlog2.f32 %v275_v27 }
 0x135   : > { %600 = vlog2.f32 %v277_v28 }
 0x13c   : > { %v595_v31 = vpop.eup %594 }
 0x13d   : > { %v360_v32 = vmul.f32 %v595_v31, %v275_v27  ;;  %v597_v33 = vpop.eup %596 }
 0x13e   : > { %v361_v37 = vmul.f32 %v597_v33, %v277_v28  ;;  %v599_v38 = vpop.eup %598 }
 0x13f   : > { %v362_v36 = vsub.f32 2.0, %v360_v32  ;;  %v601_v41 = vpop.eup %600  ;;  %v367_v43 = vmul.f32 0.6931472, %v599_v38 }
 0x140   : > { %v363_v39 = vsub.f32 2.0, %v361_v37  ;;  %v369_v48 = vmul.f32 0.6931472, %v601_v41 }
 0x141   : > { %v364_v40 = vmul.f32 %v595_v31, %v362_v36 }
 0x142   : > { %v365_v45 = vmul.f32 %v597_v33, %v363_v39 }
 0x143   : > { %v370_v44 = vmul.f32 %v364_v40, %v353_v29 }
 0x144   : > { %v371_v49 = vmul.f32 %v365_v45, %v355_v30 }
 0x145   : > { %v372_v47 = vsub.f32 %v367_v43, %v370_v44 }
 0x146   : > { %v373_v50 = vsub.f32 %v369_v48, %v371_v49 }
 0x148   : > { %v379_v52 = vcombine.low %v372_v47, %v373_v50 }
 0x14a   : > { %v386_v53 = vrot.slane %v379_v52, %v385_v51 }
 0x14c   : > { %v393_v55 = vrot.slane %v386_v53, %v385_v51 }
 0x14e   : > { %v395_v56 = vadd.f32 %v393_v55, %v376_v54 }
 0x150   : > { %400 = vst.msk [vmem:[%s856_s29] sm:$0x3] %vm852_vm0, %v395_v56 }
 0x151   : > { %645 = shalt.err (!%p642_p6)
}
 0x152   : > { %s646_s16 = scalar_lea.hbm %s874_s4, 32  ;;  %s650_s23 = scalar_lea.hbm %s927_s1, 64 }
 0x153   : > { %p647_p4 = scmp.ne.s32.totalorder %s874_s4, %s646_s16  ;;  %p651_p1 = scmp.lt.u32.totalorder %s874_s4, %s927_s1 }
 0x154   : > { %p652_p2 = scmp.lt.u32.totalorder %s650_s23, %s646_s16  ;;  %p654_p8 = scmp.lt.u32.totalorder %s646_s16, %s874_s4 }
 0x155   : > { %p648_p10 = pnand %p647_p4, %p938_p9 }
 0x156   : > { %p653_p5 = por %p652_p2, %p651_p1 }
 0x157   : > { %p649_p12 = pneg %p648_p10 }
 0x158   : > { %p655_p11 = por %p654_p8, %p653_p5 }
 0x15a   : > { %p656_p0 = pnand %p655_p11, %p649_p12 }
 0x15c   : > { %659 = shalt.err (!%p656_p0)
}
 0x15d   : > { %528 = dma.vmem_to_hbm [thread:$0]  (%p938_p9), %s876_s30, 32, %s874_s4, %s402_s5  }
 0x15e PF: > { %s429_s26 = sand.u32 1, %s694_s6   ;;  %p939_p7 = scmp.ne.s32.totalorder %s932_s21, 0 }
 0x15f   : > { %p940_p13 = scmp.ge.s32.totalorder %s714_s11, 2  ;;  %s430_s28 = scalar_lea.sflag [#allocation4], %s429_s26 }
 0x161   : > { %p535_p3 = pnand %p940_p13, %p939_p7 }
 0x163   : > { %689 = dma.done.wait (!%p535_p3), %s430_s28, 32  }
 0x164   : > { %691 = vsyncadd (!%p535_p3), %s430_s28, 4294967264  ;;  %s17_s11 = sadd.s32 1, %s714_s11   ;;  %s941_s6 = smov %s698_s7 }
 0x165   : > { %p14_p6 = scmp.ge.s32.totalorder %s17_s11, 4   ;;  %s942_s7 = smov %s702_s8 }
 0x166   : > { %s943_s8 = smov %s787_s20  ;;  %s944_s9 = smov %s710_s10 }
 0x167   : > { %s945_s10 = smov %s947_s14  ;;  %16 = sbr.rel (!%p14_p6) target bundleno = 6 (0x6), region = 73 }
 0x16e   :  { %435 = vsyncpa [#allocation3], 1 }
 0x16f   :  { %437 = vsyncpa [#allocation3 + $0x1], 1 }
 0x170   :  { %438 = vsyncpa [#allocation4], 1 }
 0x171   :  { %440 = vsyncpa [#allocation4 + $0x1], 1 }

</bundles_post_ra>
